<compile_context>
chip_gen: v7x
topology: tpu7x:2x2x1
jax: 0.10.0
libtpu: 0.0.40
codegen_flags: <defaults>
</compile_context>

<pallas_src>
import jax
import jax.numpy as jnp
from jax.experimental import pallas as pl
from jax.experimental.pallas import tpu as pltpu


def _round_up(x, m):
    return ((x + m - 1) // m) * m


def _make_mlp_kernel(n_deep_layers):
    """Kernel: split first Linear+ReLU, `n_deep_layers` Linear+ReLU, sigmoid head."""

    def kernel(u_ref, it_ref, w1u_ref, w1i_ref, b1_ref, *rest):
        # rest = (w2, b2, ..., w_out, b_out, o_ref)
        o_ref = rest[-1]
        params = rest[:-1]

        # bf16 is storage/DMA format only; upcast once, keep all math in f32.
        u = u_ref[...].astype(jnp.float32)    # [TB, E]
        v = it_ref[...].astype(jnp.float32)   # [TB, E]

        # First layer in transposed layout: h = relu(W1_u @ u.T + W1_it @ it.T + b1)
        # dot_general contracts the embedding dim of both operands -> [L1, TB].
        dn = (((1,), (1,)), ((), ()))
        h = jax.lax.dot_general(w1u_ref[...], u, dn,
                                preferred_element_type=jnp.float32)
        h = h + jax.lax.dot_general(w1i_ref[...], v, dn,
                                    preferred_element_type=jnp.float32)
        h = jnp.maximum(h + b1_ref[...], 0.0)          # [L1, TB]
        # Dropout: identity in eval mode.

        for li in range(n_deep_layers):
            w = params[2 * li][...]                    # [L_i, L_{i-1}]
            b = params[2 * li + 1][...]                # [L_i, 1]
            h = jnp.dot(w, h, preferred_element_type=jnp.float32) + b
            h = jnp.maximum(h, 0.0)                    # [L_i, TB]

        w_out = params[-2][...]                        # [L_last, 1]
        b_out = params[-1][...]                        # [1, 1]
        # Output head: broadcast multiply + cross-sublane reduce (no N=1 MXU matmul).
        logits = jnp.sum(h * w_out, axis=0, keepdims=True) + b_out   # [1, TB]
        o_ref[...] = jax.nn.sigmoid(logits)[None]      # (1, 1, TB) lane-dense store

    return kernel


def mlp_forward_pallas(u, it, first_params, deep_params, out_params, *, tile=512):
    """u, it: [B, E] (bf16/f32) gathered embeddings.  Returns sigmoid preds [B, 1] f32."""
    B, E = u.shape
    w1_u, w1_it, b1 = first_params
    w_out, b_out = out_params
    L1 = w1_u.shape[0]

    # Batch tile: multiple of 128 (lane-dense output), capped at `tile` rows.
    TB = min(tile, _round_up(max(B, 1), 128))
    B_pad = _round_up(B, TB)
    if B_pad != B:
        pad = ((0, B_pad - B), (0, 0))
        u = jnp.pad(u, pad)
        it = jnp.pad(it, pad)
    num_tiles = B_pad // TB

    flat_params = [w1_u, w1_it, b1]
    for w, b in deep_params:
        flat_params += [w, b]
    flat_params += [w_out, b_out]

    act_spec = pl.BlockSpec((TB, E), lambda i: (i, 0))
    # Weights/biases: full-array blocks, constant index_map -> VMEM-resident.
    param_specs = [pl.BlockSpec(p.shape, lambda i: (0, 0)) for p in flat_params]

    # Advisory cost estimate (workload is HBM-bandwidth bound).
    flops = 4 * E * L1
    prev = L1
    for w, _ in deep_params:
        flops += 2 * prev * w.shape[0]
        prev = w.shape[0]
    flops += 2 * prev
    flops *= B_pad
    bytes_accessed = (u.nbytes + it.nbytes
                      + sum(int(p.nbytes) for p in flat_params)
                      + B_pad * 4)

    kernel = _make_mlp_kernel(len(deep_params))
    out = pl.pallas_call(
        kernel,
        out_shape=jax.ShapeDtypeStruct((num_tiles, 1, TB), jnp.float32),
        grid=(num_tiles,),
        in_specs=[act_spec, act_spec] + param_specs,
        out_specs=pl.BlockSpec((1, 1, TB), lambda i: (i, 0, 0)),
        compiler_params=pltpu.CompilerParams(
            dimension_semantics=("parallel",)),
        cost_estimate=pl.CostEstimate(
            flops=int(flops),
            transcendentals=int(B_pad),
            bytes_accessed=int(bytes_accessed)),
    )(u, it, *flat_params)

    return out.reshape(B_pad)[:B].reshape(B, 1)


class MLPPallas:
    """JAX/Pallas re-implementation of the NCF MLP module (inference forward)."""

    def __init__(self, n_user, n_item, layers, dropouts, key):
        assert layers[0] % 2 == 0, "layers[0] is the concat of user+item embeddings"
        self.layers = list(layers)
        self.dropouts = dropouts          # unused at inference
        emb_dim = layers[0] // 2
        self.emb_dim = emb_dim

        keys = jax.random.split(key, 2 + 2 * len(layers))
        # Synthetic stand-ins for user_emb.dat / item_emb.dat, stored bf16
        # (dominant HBM stream; upcast to f32 inside the kernel).
        self.user_emb = (jax.random.normal(keys[0], (n_user, emb_dim), jnp.float32)
                         * 0.1).astype(jnp.bfloat16)
        self.item_emb = (jax.random.normal(keys[1], (n_item, emb_dim), jnp.float32)
                         * 0.1).astype(jnp.bfloat16)

        # Linear layers, PyTorch init U(-1/sqrt(fan_in), 1/sqrt(fan_in)).
        # Weights kept in torch [out, in] layout (kernel computes W @ h).
        k = 2
        fan_in, fan_out = layers[0], layers[1]
        bound = 1.0 / float(fan_in) ** 0.5
        w1 = jax.random.uniform(keys[k], (fan_out, fan_in), jnp.float32, -bound, bound)
        b1 = jax.random.uniform(keys[k + 1], (fan_out, 1), jnp.float32, -bound, bound)
        # Split the first layer over the (user, item) concat -> concat never materialized.
        self.first_params = (w1[:, :emb_dim], w1[:, emb_dim:], b1)
        k += 2

        self.deep_params = []
        for i in range(2, len(layers)):
            fan_in, fan_out = layers[i - 1], layers[i]
            bound = 1.0 / float(fan_in) ** 0.5
            w = jax.random.uniform(keys[k], (fan_out, fan_in), jnp.float32, -bound, bound)
            b = jax.random.uniform(keys[k + 1], (fan_out, 1), jnp.float32, -bound, bound)
            self.deep_params.append((w, b))
            k += 2

        fan_in = layers[-1]
        bound = 1.0 / float(fan_in) ** 0.5
        w_out = jax.random.uniform(keys[k], (fan_in, 1), jnp.float32, -bound, bound)
        b_out = jax.random.uniform(keys[k + 1], (1, 1), jnp.float32, -bound, bound)
        self.out_params = (w_out, b_out)

    def __call__(self, users, items):
        # Embedding gathers stay in XLA; the concat is folded into the split W1.
        u = jnp.take(self.user_emb, users, axis=0)    # [B, E] bf16
        it = jnp.take(self.item_emb, items, axis=0)   # [B, E] bf16
        return mlp_forward_pallas(u, it, self.first_params, self.deep_params,
                                  self.out_params)

    def reference(self, users, items):
        """Pure-JAX reference for correctness checking."""
        u = jnp.take(self.user_emb, users, axis=0).astype(jnp.float32)
        it = jnp.take(self.item_emb, items, axis=0).astype(jnp.float32)
        w1_u, w1_it, b1 = self.first_params
        h = jnp.maximum(u @ w1_u.T + it @ w1_it.T + b1.reshape(1, -1), 0.0)
        for w, b in self.deep_params:
            h = jnp.maximum(h @ w.T + b.reshape(1, -1), 0.0)
        w_out, b_out = self.out_params
        return jax.nn.sigmoid(h @ w_out + b_out.reshape(1, 1))


if __name__ == "__main__":
    key = jax.random.PRNGKey(0)
    k_model, k_users, k_items = jax.random.split(key, 3)

    n_user, n_item = 10, 12
    layers = [32, 16, 8]          # layers[0] = 2 * emb_dim  (emb_dim = 16)
    dropouts = [0.2, 0.2]
    batch = 8

    model = MLPPallas(n_user, n_item, layers, dropouts, k_model)

    users = jax.random.randint(k_users, (batch,), 0, n_user, dtype=jnp.int32)
    items = jax.random.randint(k_items, (batch,), 0, n_item, dtype=jnp.int32)

    preds = jax.block_until_ready(model(users, items))
    ref = jax.block_until_ready(model.reference(users, items))

    assert preds.shape == (batch, 1)
    assert jnp.allclose(preds, ref, atol=1e-4, rtol=1e-4), (
        "mismatch vs JAX reference: max abs err "
        f"{float(jnp.max(jnp.abs(preds - ref))):.3e}")

    print("KERNEL_OK")
</pallas_src>

<mosaic_0001>
module attributes {stable_mosaic.version = 11 : i64} {
  func.func @kernel(%arg0: i32, %arg1: memref<128x16xbf16, #tpu.memory_space<vmem>>, %arg2: memref<128x16xbf16, #tpu.memory_space<vmem>>, %arg3: memref<16x16xf32, #tpu.memory_space<vmem>>, %arg4: memref<16x16xf32, #tpu.memory_space<vmem>>, %arg5: memref<16x1xf32, #tpu.memory_space<vmem>>, %arg6: memref<8x16xf32, #tpu.memory_space<vmem>>, %arg7: memref<8x1xf32, #tpu.memory_space<vmem>>, %arg8: memref<8x1xf32, #tpu.memory_space<vmem>>, %arg9: memref<1x1xf32, #tpu.memory_space<vmem>>, %arg10: memref<1x1x128xf32, #tpu.memory_space<vmem>>) attributes {dimension_semantics = [#tpu.dimension_semantics<parallel>], iteration_bounds = array<i64: 1>, scalar_prefetch = 0 : i64, scratch_operands = 0 : i64, tpu.core_type = #tpu.core_type<tc>, window_params = [{transform_indices = @transform_0, window_bounds = array<i64: 128, 16>}, {transform_indices = @transform_1, window_bounds = array<i64: 128, 16>}, {pipeline_mode = #tpu.pipeline_mode<synchronous>, transform_indices = @transform_2, window_bounds = array<i64: 16, 16>}, {pipeline_mode = #tpu.pipeline_mode<synchronous>, transform_indices = @transform_3, window_bounds = array<i64: 16, 16>}, {pipeline_mode = #tpu.pipeline_mode<synchronous>, transform_indices = @transform_4, window_bounds = array<i64: 16, 1>}, {pipeline_mode = #tpu.pipeline_mode<synchronous>, transform_indices = @transform_5, window_bounds = array<i64: 8, 16>}, {pipeline_mode = #tpu.pipeline_mode<synchronous>, transform_indices = @transform_6, window_bounds = array<i64: 8, 1>}, {pipeline_mode = #tpu.pipeline_mode<synchronous>, transform_indices = @transform_7, window_bounds = array<i64: 8, 1>}, {pipeline_mode = #tpu.pipeline_mode<synchronous>, transform_indices = @transform_8, window_bounds = array<i64: 1, 1>}, {transform_indices = @transform_9, window_bounds = array<i64: 1, 1, 128>}]} {
    %c0 = arith.constant 0 : index
    %c0_0 = arith.constant 0 : index
    %0 = vector.load %arg1[%c0, %c0_0] : memref<128x16xbf16, #tpu.memory_space<vmem>>, vector<128x16xbf16>
    %1 = arith.extf %0 : vector<128x16xbf16> to vector<128x16xf32>
    %c0_1 = arith.constant 0 : index
    %c0_2 = arith.constant 0 : index
    %2 = vector.load %arg2[%c0_1, %c0_2] : memref<128x16xbf16, #tpu.memory_space<vmem>>, vector<128x16xbf16>
    %3 = arith.extf %2 : vector<128x16xbf16> to vector<128x16xf32>
    %c0_3 = arith.constant 0 : index
    %c0_4 = arith.constant 0 : index
    %4 = vector.load %arg3[%c0_3, %c0_4] : memref<16x16xf32, #tpu.memory_space<vmem>>, vector<16x16xf32>
    %cst = arith.constant dense<0.000000e+00> : vector<16x128xf32>
    %5 = tpu.matmul %4, %1, %cst {dimension_numbers = #tpu.dot_dimension_numbers<[1], [1], [0], [0], [0, 0, 1, 0], [], []>} : vector<16x16xf32>, vector<128x16xf32>, vector<16x128xf32> -> vector<16x128xf32>
    %c0_5 = arith.constant 0 : index
    %c0_6 = arith.constant 0 : index
    %6 = vector.load %arg4[%c0_5, %c0_6] : memref<16x16xf32, #tpu.memory_space<vmem>>, vector<16x16xf32>
    %cst_7 = arith.constant dense<0.000000e+00> : vector<16x128xf32>
    %7 = tpu.matmul %6, %3, %cst_7 {dimension_numbers = #tpu.dot_dimension_numbers<[1], [1], [0], [0], [0, 0, 1, 0], [], []>} : vector<16x16xf32>, vector<128x16xf32>, vector<16x128xf32> -> vector<16x128xf32>
    %8 = arith.addf %5, %7 : vector<16x128xf32>
    %c0_8 = arith.constant 0 : index
    %c0_9 = arith.constant 0 : index
    %9 = vector.load %arg5[%c0_8, %c0_9] : memref<16x1xf32, #tpu.memory_space<vmem>>, vector<16x1xf32>
    %10 = vector.broadcast %9 : vector<16x1xf32> to vector<16x128xf32>
    %11 = arith.addf %8, %10 : vector<16x128xf32>
    %cst_10 = arith.constant 0.000000e+00 : f32
    %12 = vector.broadcast %cst_10 : f32 to vector<16x128xf32>
    %13 = arith.maximumf %11, %12 : vector<16x128xf32>
    %c0_11 = arith.constant 0 : index
    %c0_12 = arith.constant 0 : index
    %14 = vector.load %arg6[%c0_11, %c0_12] : memref<8x16xf32, #tpu.memory_space<vmem>>, vector<8x16xf32>
    %c0_13 = arith.constant 0 : index
    %c0_14 = arith.constant 0 : index
    %15 = vector.load %arg7[%c0_13, %c0_14] : memref<8x1xf32, #tpu.memory_space<vmem>>, vector<8x1xf32>
    %cst_15 = arith.constant dense<0.000000e+00> : vector<8x128xf32>
    %16 = tpu.matmul %14, %13, %cst_15 {dimension_numbers = #tpu.dot_dimension_numbers<[1], [0], [0], [1], [0, 0, 1, 1], [], []>} : vector<8x16xf32>, vector<16x128xf32>, vector<8x128xf32> -> vector<8x128xf32>
    %17 = vector.broadcast %15 : vector<8x1xf32> to vector<8x128xf32>
    %18 = arith.addf %16, %17 : vector<8x128xf32>
    %cst_16 = arith.constant 0.000000e+00 : f32
    %19 = vector.broadcast %cst_16 : f32 to vector<8x128xf32>
    %20 = arith.maximumf %18, %19 : vector<8x128xf32>
    %c0_17 = arith.constant 0 : index
    %c0_18 = arith.constant 0 : index
    %21 = vector.load %arg8[%c0_17, %c0_18] : memref<8x1xf32, #tpu.memory_space<vmem>>, vector<8x1xf32>
    %c0_19 = arith.constant 0 : index
    %c0_20 = arith.constant 0 : index
    %22 = vector.load %arg9[%c0_19, %c0_20] : memref<1x1xf32, #tpu.memory_space<vmem>>, vector<1x1xf32>
    %23 = vector.broadcast %21 : vector<8x1xf32> to vector<8x128xf32>
    %24 = arith.mulf %20, %23 : vector<8x128xf32>
    %cst_21 = arith.constant dense<0.000000e+00> : vector<128xf32>
    %25 = vector.multi_reduction <add>, %24, %cst_21 [0] : vector<8x128xf32> to vector<128xf32>
    %26 = vector.shape_cast %25 : vector<128xf32> to vector<1x128xf32>
    %27 = vector.broadcast %22 : vector<1x1xf32> to vector<1x128xf32>
    %28 = arith.addf %26, %27 : vector<1x128xf32>
    %29 = arith.negf %28 : vector<1x128xf32>
    %30 = math.exp %29 : vector<1x128xf32>
    %cst_22 = arith.constant 1.000000e+00 : f32
    %31 = vector.broadcast %cst_22 : f32 to vector<1x128xf32>
    %32 = arith.addf %31, %30 : vector<1x128xf32>
    %33 = arith.divf %31, %32 : vector<1x128xf32>
    %34 = vector.shape_cast %33 : vector<1x128xf32> to vector<1x1x128xf32>
    %c0_23 = arith.constant 0 : index
    %c0_24 = arith.constant 0 : index
    %c0_25 = arith.constant 0 : index
    %35 = vector.load %arg10[%c0_23, %c0_24, %c0_25] : memref<1x1x128xf32, #tpu.memory_space<vmem>>, vector<1x1x128xf32>
    tpu.vector_store %arg10[%c0_23, %c0_24, %c0_25], %34 {strides = array<i32>} : memref<1x1x128xf32, #tpu.memory_space<vmem>>, vector<1x1x128xf32>,
    return
  }
  func.func @transform_0(%arg0: i32) -> (i32, i32) {
    %c0_i32 = arith.constant 0 : i32
    %c0_i32_0 = arith.constant 0 : i32
    return %arg0, %c0_i32 : i32, i32
  }
  func.func @transform_1(%arg0: i32) -> (i32, i32) {
    %c0_i32 = arith.constant 0 : i32
    %c0_i32_0 = arith.constant 0 : i32
    return %arg0, %c0_i32 : i32, i32
  }
  func.func @transform_2(%arg0: i32) -> (i32, i32) {
    %c0_i32 = arith.constant 0 : i32
    %c0_i32_0 = arith.constant 0 : i32
    %c0_i32_1 = arith.constant 0 : i32
    return %c0_i32, %c0_i32_0 : i32, i32
  }
  func.func @transform_3(%arg0: i32) -> (i32, i32) {
    %c0_i32 = arith.constant 0 : i32
    %c0_i32_0 = arith.constant 0 : i32
    %c0_i32_1 = arith.constant 0 : i32
    return %c0_i32, %c0_i32_0 : i32, i32
  }
  func.func @transform_4(%arg0: i32) -> (i32, i32) {
    %c0_i32 = arith.constant 0 : i32
    %c0_i32_0 = arith.constant 0 : i32
    %c0_i32_1 = arith.constant 0 : i32
    return %c0_i32, %c0_i32_0 : i32, i32
  }
  func.func @transform_5(%arg0: i32) -> (i32, i32) {
    %c0_i32 = arith.constant 0 : i32
    %c0_i32_0 = arith.constant 0 : i32
    %c0_i32_1 = arith.constant 0 : i32
    return %c0_i32, %c0_i32_0 : i32, i32
  }
  func.func @transform_6(%arg0: i32) -> (i32, i32) {
    %c0_i32 = arith.constant 0 : i32
    %c0_i32_0 = arith.constant 0 : i32
    %c0_i32_1 = arith.constant 0 : i32
    return %c0_i32, %c0_i32_0 : i32, i32
  }
  func.func @transform_7(%arg0: i32) -> (i32, i32) {
    %c0_i32 = arith.constant 0 : i32
    %c0_i32_0 = arith.constant 0 : i32
    %c0_i32_1 = arith.constant 0 : i32
    return %c0_i32, %c0_i32_0 : i32, i32
  }
  func.func @transform_8(%arg0: i32) -> (i32, i32) {
    %c0_i32 = arith.constant 0 : i32
    %c0_i32_0 = arith.constant 0 : i32
    %c0_i32_1 = arith.constant 0 : i32
    return %c0_i32, %c0_i32_0 : i32, i32
  }
  func.func @transform_9(%arg0: i32) -> (i32, i32, i32) {
    %c0_i32 = arith.constant 0 : i32
    %c0_i32_0 = arith.constant 0 : i32
    %c0_i32_1 = arith.constant 0 : i32
    return %arg0, %c0_i32, %c0_i32_0 : i32, i32, i32
  }
}

</mosaic_0001>

<bundles_post_ra>
// kernel: tpu_custom_call.1
= control target key start
LH: loop header
LB: loop body
LE: loop exit
PB: predicated region body
PF: predicated region fallthrough
CT: control target
= control target key end

     0   :  { %s1092_s0 = inlined_call_operand.vmem [shape: bf16[128,16], index: 0, kind: input, shape index: {}]   ;;  %s1093_s1 = inlined_call_operand.vmem [shape: bf16[128,16], index: 1, kind: input, shape index: {}]   ;;  %s1094_s2 = inlined_call_operand.vmem [shape: f32[16,16], index: 2, kind: input, shape index: {}]   ;;  %s1095_s3 = inlined_call_operand.vmem [shape: f32[16,16], index: 3, kind: input, shape index: {}]   ;;  %s1096_s4 = inlined_call_operand.vmem [shape: f32[16,1], index: 4, kind: input, shape index: {}]   ;;  %s1097_s5 = inlined_call_operand.vmem [shape: f32[8,16], index: 5, kind: input, shape index: {}]   ;;  %s1098_s6 = inlined_call_operand.vmem [shape: f32[8,1], index: 6, kind: input, shape index: {}]   ;;  %s1099_s7 = inlined_call_operand.vmem [shape: f32[8,1], index: 7, kind: input, shape index: {}]   ;;  %s1100_s8 = inlined_call_operand.<no memory space> [shape: f32[1,1], index: 8, kind: input, shape index: {}]   ;;  %s1101_s9 = inlined_call_operand.hbm [shape: f32[1,1,128], index: 9, kind: output, shape index: {}]  }
   0x1   :  { %v14_v0 = vstv %s1100_s8 }
   0x2   :  { %15 = vst [vmem:[#allocation2] sm:$0x1] %v14_v0 }
   0x3   :  { %v575_v1 = vld [vmem:[%s1093_s1] sm:$0xff]   ;;  %vm103_vm0 = vcmask 130048   ;;  %v613_v4 = vld [vmem:[%s1093_s1 + $0x8] sm:$0xff]   ;;  %v872_v6 = vmov 0  }
   0x4   :  { %v543_v2 = vld [vmem:[%s1092_s0] sm:$0xff]   ;;  %vm938_vm1 = vmpackc.low %vm103_vm0, %vm103_vm0  ;;  %v606_v5 = vld [vmem:[%s1092_s0 + $0x8] sm:$0xff]   ;;  %842 = vset.pattern.permute.xlu0 %v872_v6  ;;  %843 = vset.pattern.permute.xlu1 %v872_v6 }
   0x5   :  { %738 = vmatprep.subr.msk.bf16.mxu1 %vm938_vm1, %v575_v1  ;;  %786 = vmatprep.subr.msk.bf16.mxu0 %vm938_vm1, %v543_v2  ;;  %v101_v7 = vld [vmem:[%s1095_s3] sm:$0xff] }
   0x6   :  { %741 = vmatpush3.bf16.xpose.msk.msra.mxu1 %vm938_vm1, %v575_v1  ;;  %789 = vmatpush3.bf16.xpose.msk.msra.mxu0 %vm938_vm1, %v543_v2  ;;  %v99_v8 = vld [vmem:[%s1094_s2] sm:$0xff] }
   0x7   :  { %744 = vmatprep.subr.msk.bf16.mxu1 %vm938_vm1, %v613_v4  ;;  %792 = vmatprep.subr.msk.bf16.mxu0 %vm938_vm1, %v606_v5  ;;  %v362_v9 = vld [vmem:[%s1096_s4] sm:$0xff] }
   0x8   :  { %691 = vmatprep.mubr.msk.f32.mxu1 %vm103_vm0, %v101_v7  ;;  %726 = vmatprep.mubr.msk.f32.mxu0 %vm103_vm0, %v99_v8 }
   0x9   :  { %366 = vperm.xlu0 %842, %v362_v9  }
   0xa   :  { %16 = vsyncpa [#allocation4], 0  ;;  %v614_v10 = vld [vmem:[%s1093_s1 + $0x10] sm:$0xff]   ;;  %v363_v12 = vld [vmem:[%s1096_s4 + $0x8] sm:$0xff]  ;;  %v873_v26 = vmov 0.0|0.0   ;;  %vm874_vm2 = vmmov 0   ;;  %v478_v50 = vlaneseq }
   0xb   :  { %v607_v11 = vld [vmem:[%s1092_s0 + $0x10] sm:$0xff]   ;;  %v460_v13 = vld [vmem:[#allocation2] sm:$0x1]  ;;  %v615_v14 = vld [vmem:[%s1093_s1 + $0x18] sm:$0xff]   ;;  %v875_v27 = vmov 0.0  }
   0xc   :  { %v608_v15 = vld [vmem:[%s1092_s0 + $0x18] sm:$0xff]   ;;  %v616_v16 = vld [vmem:[%s1093_s1 + $0x20] sm:$0xff]   ;;  %v617_v18 = vld [vmem:[%s1093_s1 + $0x28] sm:$0xff]   ;;  %v479_v53 = vshrl.u32 %v478_v50, 7 }
   0xd   :  { %371 = vperm.xlu0 %842, %v363_v12   ;;  %v609_v17 = vld [vmem:[%s1092_s0 + $0x20] sm:$0xff]   ;;  %v610_v19 = vld [vmem:[%s1092_s0 + $0x28] sm:$0xff]   ;;  %v618_v20 = vld [vmem:[%s1093_s1 + $0x30] sm:$0xff]  }
   0xe   :  { %747 = vmatpush3.bf16.xpose.msk.msra.mxu1 %vm938_vm1, %v613_v4  ;;  %795 = vmatpush3.bf16.xpose.msk.msra.mxu0 %vm938_vm1, %v606_v5  ;;  %v611_v21 = vld [vmem:[%s1092_s0 + $0x30] sm:$0xff]   ;;  %v619_v22 = vld [vmem:[%s1093_s1 + $0x38] sm:$0xff]   ;;  %v102_v24 = vld [vmem:[%s1095_s3 + $0x8] sm:$0xff]  ;;  %v480_v56 = vsub.s32 0, %v479_v53 }
   0xf   :  { %750 = vmatprep.subr.msk.bf16.mxu1 %vm938_vm1, %v614_v10  ;;  %798 = vmatprep.subr.msk.bf16.mxu0 %vm938_vm1, %v607_v11  ;;  %v612_v23 = vld [vmem:[%s1092_s0 + $0x38] sm:$0xff]   ;;  %v100_v25 = vld [vmem:[%s1094_s2 + $0x8] sm:$0xff]  ;;  %v379_v28 = vld [vmem:[%s1098_s6] sm:$0xff] }
  0x10   :  { %382 = vperm.xlu1 %843, %v379_v28   ;;  %v459_v29 = vld [vmem:[%s1099_s7] sm:$0xff] }
  0x11   :  { %475 = vperm.xlu0 %842, %v460_v13   ;;  %v378_v43 = vld [vmem:[%s1097_s5] sm:$0xff]  ;;  %s876_s5 = smov [#allocation3]  }
  0x12   :  { %s496_s7 = sshll.u32 %s876_s5, 4  ;;  %s497_s7 = int_to_ptr.vmem [resolvable:$true] %s496_s7 }
  0x13   :  { %s848_s11 = scalar_lea.vmem %s497_s7, 16  ;;  %s852_s4 = scalar_lea.vmem %s497_s7, 32 }
  0x14   :  { %463 = vperm.xlu1 %843, %v459_v29   ;;  %p849_p0 = scmp.ne.s32.totalorder %s497_s7, %s848_s11  ;;  %p853_p1 = scmp.lt.s32.totalorder %s497_s7, %s497_s7 }
  0x15   :  { %p854_p2 = scmp.lt.s32.totalorder %s852_s4, %s848_s11 }
  0x16   :  { %753 = vmatpush3.bf16.xpose.msk.msra.mxu1 %vm938_vm1, %v614_v10  ;;  %801 = vmatpush3.bf16.xpose.msk.msra.mxu0 %vm938_vm1, %v607_v11 }
  0x17   :  { %756 = vmatprep.subr.msk.bf16.mxu1 %vm938_vm1, %v615_v14  ;;  %804 = vmatprep.subr.msk.bf16.mxu0 %vm938_vm1, %v608_v15  ;;  %p855_p3 = por %p854_p2, %p853_p1 }
  0x19   :  { %p856_p4 = pnand %p855_p3, %p849_p0 }
  0x1e   :  { %759 = vmatpush3.bf16.xpose.msk.msra.mxu1 %vm938_vm1, %v615_v14  ;;  %807 = vmatpush3.bf16.xpose.msk.msra.mxu0 %vm938_vm1, %v608_v15 }
  0x1f   :  { %762 = vmatprep.subr.msk.bf16.mxu1 %vm938_vm1, %v616_v16  ;;  %810 = vmatprep.subr.msk.bf16.mxu0 %vm938_vm1, %v609_v17 }
  0x26   :  { %765 = vmatpush3.bf16.xpose.msk.msra.mxu1 %vm938_vm1, %v616_v16  ;;  %813 = vmatpush3.bf16.xpose.msk.msra.mxu0 %vm938_vm1, %v609_v17 }
  0x27   :  { %768 = vmatprep.subr.msk.bf16.mxu1 %vm938_vm1, %v617_v18  ;;  %816 = vmatprep.subr.msk.bf16.mxu0 %vm938_vm1, %v610_v19 }
  0x2e   :  { %771 = vmatpush3.bf16.xpose.msk.msra.mxu1 %vm938_vm1, %v617_v18  ;;  %819 = vmatpush3.bf16.xpose.msk.msra.mxu0 %vm938_vm1, %v610_v19 }
  0x2f   :  { %774 = vmatprep.subr.msk.bf16.mxu1 %vm938_vm1, %v618_v20  ;;  %822 = vmatprep.subr.msk.bf16.mxu0 %vm938_vm1, %v611_v21 }
  0x36   :  { %777 = vmatpush3.bf16.xpose.msk.msra.mxu1 %vm938_vm1, %v618_v20  ;;  %825 = vmatpush3.bf16.xpose.msk.msra.mxu0 %vm938_vm1, %v611_v21 }
  0x37   :  { %780 = vmatprep.subr.msk.bf16.mxu1 %vm938_vm1, %v619_v22  ;;  %828 = vmatprep.subr.msk.bf16.mxu0 %vm938_vm1, %v612_v23 }
  0x3e   :  { %783 = vmatpush3.bf16.xpose.msk.msra.mxu1 %vm938_vm1, %v619_v22  ;;  %831 = vmatpush3.bf16.xpose.msk.msra.mxu0 %vm938_vm1, %v612_v23 }
  0x3f   :  { %832 = vmatprep.subr.bf16.mxu1 %v873_v26 }
  0x45   :  { %692 = vmatmul.mubr.msk.f32.vlgmr.msra.gmra.mrb[0].mxu1 %vm103_vm0, %v102_v24  ;;  %727 = vmatmul.mubr.msk.f32.vlgmr.msra.gmra.mrb[0].mxu0 %vm103_vm0, %v100_v25 }
  0x46   :  { %733 = vmatprep.mubr.msk.f32.mxu1 %vm874_vm2, %v875_v27 }
  0x88   :  { %v367_v30 = vpop.permute.xlu0 %366 }
  0x8c   :  { %v372_v36 = vpop.permute.xlu0 %371 }
  0x8f   :  { %v383_v44 = vpop.permute.xlu1 %382 }
  0x90   :  { %v476_v58 = vpop.permute.xlu0 %475 }
  0x91   :  { %v481_v60 = vrot.slane %v476_v58, %v480_v56 }
  0x93   :  { %v464_v49 = vpop.permute.xlu1 %463 }
 0x118   :  { %v693_v31 = vpop.f32.mrb[0].mxu1  ;;  %v728_v32 = vpop.f32.mrb[0].mxu0 }
 0x119   :  { %v359_v33 = vadd.f32 %v728_v32, %v693_v31  ;;  %v224_v34 = vpop.f32.mrb[1].mxu1  ;;  %v353_v35 = vpop.f32.mrb[1].mxu0 }
 0x11a   :  { %v354_v37 = vadd.f32 %v353_v35, %v224_v34 }
 0x11b   :  { %v375_v38 = vadd.f32 %v372_v36, %v359_v33 }
 0x11c   :  { %v374_v39 = vadd.f32 %v367_v30, %v354_v37 }
 0x11d   :  { %v377_v40 = vmax.f32 %v375_v38, 0.0 }
 0x11e   :  { %v376_v41 = vmax.f32 %v374_v39, 0.0 }
 0x120   :  { %v833_v42 = vpack.c.bf16 %v377_v40, %v376_v41 }
 0x122   :  { %834 = vmatpush3.bf16.msra.mxu1 %v833_v42 }
 0x125   :  { %734 = vmatmul.mubr.msk.f32.vlgmr.msra.gmra.mrb[2].mxu1 %vm103_vm0, %v378_v43 }
 0x1f8   :  { %v454_v45 = vpop.f32.mrb[2].mxu1 }
 0x1f9   :  { %v455_v46 = vadd.f32 %v454_v45, %v383_v44  ;;  %v735_v47 = vpop.f32.mrb[3].mxu1 }
 0x1fb   :  { %v458_v48 = vmax.f32 %v455_v46, 0.0 }
 0x1fd   :  { %v466_v51 = vmul.f32 %v464_v49, %v458_v48 }
 0x1ff   :  { %v467_v52 = vrot.slane %v466_v51, 4 }
 0x201   :  { %v468_v54 = vadd.f32 %v467_v52, %v466_v51 }
 0x203   :  { %v469_v55 = vrot.slane %v468_v54, 2 }
 0x205   :  { %v470_v57 = vadd.f32 %v469_v55, %v468_v54 }
 0x207   :  { %v471_v59 = vrot.slane %v470_v57, 1 }
 0x209   :  { %v472_v61 = vadd.f32 %v471_v59, %v470_v57 }
 0x20b   :  { %v482_v62 = vadd.f32 %v481_v60, %v472_v61 }
 0x20d   :  { %v541_v63 = vmul.f32 -1.442695, %v482_v62 }
 0x20f   :  { %844 = vpow2.f32 %v541_v63 }
 0x219   :  { %v845_v0 = vpop.eup %844 }
 0x21a   :  { %v486_v1 = vadd.f32 1.0, %v845_v0 }
 0x21c   :  { %846 = vrcp.f32 %v486_v1 }
 0x226   :  { %v847_v2 = vpop.eup %846 }
 0x227   :  { %489 = vst [vmem:[#allocation3] sm:$0x1] %v847_v2 }
 0x228   :  { %859 = shalt.err (!%p856_p4)
}
 0x229   :  { %s860_s14 = scalar_lea.hbm %s1101_s9, 16 }
 0x22a   :  { %p861_p5 = scmp.ne.s32.totalorder %s1101_s9, %s860_s14  ;;  %p864_p6 = scmp.lt.u32.totalorder %s860_s14, %s1101_s9 }
 0x22c   :  { %p866_p7 = pnand %p864_p6, %p861_p5 }
 0x22e   :  { %869 = shalt.err (!%p866_p7)
}
 0x22f   :  { %499 = dma.vmem_to_hbm [thread:$0]  %s497_s7, 16, %s1101_s9, [#allocation4]  }
 0x230   :  { %870 = dma.done.wait [#allocation4], 16  }
 0x231   :  { %871 = vsyncadd [#allocation4], 4294967280 }
 0x232   :  { %503 = vsyncpa [#allocation4], 1 }

</bundles_post_ra>
